<compile_context>
chip_gen: v5e
topology: v5e:2x2
jax: 0.10.0
libtpu: 0.0.40
codegen_flags: <defaults>
</compile_context>

<pallas_src>
import functools

import numpy as np
import jax
import jax.numpy as jnp
from jax import lax
from jax.experimental import pallas as pl
from jax.experimental.pallas import tpu as pltpu

KH, KW = 4, 4
STRIDE = 2
PAD = 1

# (phase, neighbourhood offset d) -> ConvTranspose kernel tap k.
# Output row oh = 2*a + ph reads input row ih = a - 1 + d (d in {0,1,2});
# PyTorch ConvTranspose2d: oh = ih*stride - pad + kh  =>  kh = ph + 3 - 2*d.
_PHASE_TAP = {(0, 0): 3, (0, 1): 1, (1, 1): 2, (1, 2): 0}


def _round_up(x, m):
    return ((x + m - 1) // m) * m


def _choose_tm(hw):
    # One output-row tile per image when it is small; otherwise the largest
    # divisor of H*W (multiple of 8) that keeps the f32 output tile modest.
    if hw <= 2048:
        return hw
    for cand in (2048, 1024, 512, 256, 128, 64, 32, 16, 8):
        if hw % cand == 0:
            return cand
    return hw


def _build_phase_weight(weight, k3p, n_p):
    """(Cin, Cout, 4, 4) ConvTranspose2d weight -> (3, 3*Cin, 4*Cout) bf16 panel,
    padded to (3, k3p, n_p).  Slab dh holds the column-tap-major (dw, Cin) x
    phase-major (ph, pw, Cout) weights of row tap dh (zeros for unused taps)."""
    Cin, Cout = weight.shape[0], weight.shape[1]
    sel = np.zeros((4, 2, 3), np.float32)
    for (ph, d), k in _PHASE_TAP.items():
        sel[k, ph, d] = 1.0
    # wm[dh, dw, ci, ph, pw, co] = weight[ci, co, kh(ph,dh), kw(pw,dw)] (or 0)
    wm = jnp.einsum("cokl,kpd,lqe->decpqo", weight, sel, sel)
    wm = wm.reshape(3, 3 * Cin, 4 * Cout)
    wm = jnp.pad(wm, ((0, 0), (0, k3p - 3 * Cin), (0, n_p - 4 * Cout)))
    return wm.astype(jnp.bfloat16)


def _fused_kernel(x_ref, w_ref, o_ref, *, tm, row_w):
    # x_ref: ((H+2)*W, K3p) bf16 -- one column-folded, row-flattened padded image
    # w_ref: (3, K3p, tn)   bf16 -- per-row-tap phase-embedded weight slabs
    # o_ref: (tm, tn)       f32  -- one output row/column tile (single store)
    base = pl.multiple_of(pl.program_id(1) * tm, tm)
    acc = jnp.dot(x_ref[pl.ds(base, tm), :], w_ref[0],
                  preferred_element_type=jnp.float32)
    acc = acc + jnp.dot(x_ref[pl.ds(base + row_w, tm), :], w_ref[1],
                        preferred_element_type=jnp.float32)
    acc = acc + jnp.dot(x_ref[pl.ds(base + 2 * row_w, tm), :], w_ref[2],
                        preferred_element_type=jnp.float32)
    o_ref[...] = jnp.maximum(acc, 0.0).astype(o_ref.dtype)


def _conv_transpose_relu_xla(x, weight, precision=None):
    """Plain-XLA ConvTranspose2d((4,4), s=2, p=1, no bias) + ReLU
    (used as numeric reference and as fallback for degenerate shapes)."""
    w_conv = jnp.flip(weight, axis=(2, 3)).transpose(1, 0, 2, 3)   # (Cout,Cin,4,4)
    y = lax.conv_general_dilated(
        x, w_conv,
        window_strides=(1, 1),
        padding=((KH - 1 - PAD, KH - 1 - PAD), (KW - 1 - PAD, KW - 1 - PAD)),
        lhs_dilation=(STRIDE, STRIDE),
        dimension_numbers=("NCHW", "OIHW", "NCHW"),
        precision=precision)
    return jnp.maximum(y, 0.0)


@jax.jit
def unet_up(x, weight):
    """ConvTranspose2d(Cin, Cout, (4,4), stride=2, padding=1, bias=False) + ReLU.

    x:      (N, Cin, H, W)    float32
    weight: (Cin, Cout, 4, 4) float32 (PyTorch ConvTranspose2d layout)
    returns (N, Cout, 2H, 2W) float32
    """
    N, Cin, H, W = x.shape
    Cout = weight.shape[1]
    HW = H * W

    if HW % 8 != 0 and N > 1:
        # TODO(synk): degenerate spatial sizes (H*W not a multiple of 8 with N>1)
        # take the plain-XLA transposed-conv path instead of the Pallas kernel.
        return _conv_transpose_relu_xla(x, weight)

    K3 = 3 * Cin
    K3p = _round_up(K3, 8)
    Nout = 4 * Cout
    Np = _round_up(Nout, 128)

    # --- fold the 3 column taps in XLA, already in bf16 (row taps stay in-kernel)
    x_nhwc = jnp.transpose(x, (0, 2, 3, 1)).astype(jnp.bfloat16)   # (N,H,W,Cin)
    xp = jnp.pad(x_nhwc, ((0, 0), (1, 1), (1, 1), (0, 0)))         # (N,H+2,W+2,Cin)
    cols = [lax.slice(xp, (0, 0, dw, 0), (N, H + 2, dw + W, Cin)) for dw in range(3)]
    xf = jnp.concatenate(cols, axis=-1)                            # (N,H+2,W,3Cin)
    if K3p != K3:
        xf = jnp.pad(xf, ((0, 0), (0, 0), (0, 0), (0, K3p - K3)))
    xf = xf.reshape(N, (H + 2) * W, K3p)                           # rows: r*W + b

    wm = _build_phase_weight(weight, K3p, Np)                      # (3,K3p,Np) bf16

    tm = _choose_tm(HW)
    n_i = HW // tm
    tn = Np if Np <= 512 else next(t for t in (512, 256, 128) if Np % t == 0)

    def vmem_need(tn_):
        xb = (H + 2) * W * K3p * 2          # resident padded image (bf16)
        wb = 3 * K3p * tn_ * 2              # weight panel (bf16)
        ob = tm * tn_ * 4                   # output tile (f32)
        return 2 * (xb + wb + ob) + (4 << 20)

    if vmem_need(tn) > (44 << 20) and tn > 128:   # keep v7x (64 MiB VMEM) safe
        tn = 128
    n_j = Np // tn

    kernel = functools.partial(_fused_kernel, tm=tm, row_w=W)
    grid = (N, n_i, n_j)

    out_flat = pl.pallas_call(
        kernel,
        out_shape=jax.ShapeDtypeStruct((N * HW, Np), jnp.float32),
        grid=grid,
        in_specs=[
            # whole padded image: stays VMEM-resident across the i/j axes
            pl.BlockSpec((None, (H + 2) * W, K3p), lambda n, i, j: (n, 0, 0)),
            # weight panel: constant block -> DMA'd once when n_j == 1
            pl.BlockSpec((3, K3p, tn), lambda n, i, j: (0, 0, j)),
        ],
        out_specs=pl.BlockSpec((tm, tn), lambda n, i, j: (n * n_i + i, j)),
        compiler_params=pltpu.CompilerParams(
            dimension_semantics=("parallel", "parallel", "parallel"),
            vmem_limit_bytes=int(min(max(vmem_need(tn), 16 << 20), 60 << 20))),
        cost_estimate=pl.CostEstimate(
            flops=2 * N * HW * 3 * K3p * Np,
            transcendentals=0,
            bytes_accessed=xf.size * 2 + wm.size * 2 + N * HW * Np * 4),
    )(xf, wm)

    # Un-pad + interleave the 2x2 phases back to NCHW (one f32 XLA copy; kept in
    # f32 for strict output parity with the PyTorch module layout).
    out = out_flat[:, :Nout].reshape(N, H, W, 2, 2, Cout)
    out = out.transpose(0, 5, 1, 3, 2, 4)                 # (N, Cout, H, 2, W, 2)
    out = out.reshape(N, Cout, 2 * H, 2 * W)
    # TODO(synk): nn.Dropout is the identity for the reference default dropout=0.0
    # and is omitted; the FLOP-optimal per-phase weight split (16/36 taps) is left
    # for compute-bound (v7x, channel-heavy) layers.
    return out


if __name__ == "__main__":
    key = jax.random.PRNGKey(0)
    kx, kw = jax.random.split(key)

    N, Cin, H, W = 2, 4, 16, 16
    Cout = 8

    x = jax.random.normal(kx, (N, Cin, H, W), dtype=jnp.float32)
    # Deterministic Kaiming-uniform-ish init for the ConvTranspose2d weight.
    fan_in = Cin * KH * KW
    bound = 1.0 / float(np.sqrt(fan_in))
    weight = jax.random.uniform(kw, (Cin, Cout, KH, KW),
                                dtype=jnp.float32, minval=-bound, maxval=bound)

    out = jax.block_until_ready(unet_up(x, weight))

    # Kernel uses bf16 operands (f32 MXU accumulation); compare against an f32
    # reference evaluated on the same bf16-rounded operands.
    x_bf = x.astype(jnp.bfloat16).astype(jnp.float32)
    w_bf = weight.astype(jnp.bfloat16).astype(jnp.float32)
    ref = jax.block_until_ready(
        _conv_transpose_relu_xla(x_bf, w_bf, precision=lax.Precision.HIGHEST))

    assert out.shape == (N, Cout, 2 * H, 2 * W), out.shape
    assert jnp.allclose(out, ref, atol=2e-3, rtol=2e-3), \
        float(jnp.max(jnp.abs(out - ref)))

    print("KERNEL_OK")
</pallas_src>

<mosaic_0001>
module attributes {stable_mosaic.version = 11 : i64} {
  func.func @_fused_kernel(%arg0: i32, %arg1: i32, %arg2: i32, %arg3: memref<1x288x16xbf16, #tpu.memory_space<vmem>>, %arg4: memref<3x16x128xbf16, #tpu.memory_space<vmem>>, %arg5: memref<256x128xf32, #tpu.memory_space<vmem>>) attributes {dimension_semantics = [#tpu.dimension_semantics<parallel>, #tpu.dimension_semantics<parallel>, #tpu.dimension_semantics<parallel>], iteration_bounds = array<i64: 2, 1, 1>, scalar_prefetch = 0 : i64, scratch_operands = 0 : i64, tpu.core_type = #tpu.core_type<tc>, window_params = [{transform_indices = @transform_0, window_bounds = array<i64: 1, 288, 16>}, {transform_indices = @transform_1, window_bounds = array<i64: 3, 16, 128>}, {transform_indices = @transform_2, window_bounds = array<i64: 256, 128>}]} {
    %c256_i32 = arith.constant 256 : i32
    %0 = arith.muli %arg1, %c256_i32 : i32
    %1 = tpu.assume_multiple %0, 256 : i32
    %c0 = arith.constant 0 : index
    %2 = arith.index_cast %1 : i32 to index
    %c0_0 = arith.constant 0 : index
    %3 = vector.load %arg3[%c0, %2, %c0_0] : memref<1x288x16xbf16, #tpu.memory_space<vmem>>, vector<1x256x16xbf16>
    %4 = vector.shape_cast %3 : vector<1x256x16xbf16> to vector<256x16xbf16>
    %c0_1 = arith.constant 0 : index
    %c0_2 = arith.constant 0 : index
    %c0_3 = arith.constant 0 : index
    %5 = vector.load %arg4[%c0_1, %c0_2, %c0_3] : memref<3x16x128xbf16, #tpu.memory_space<vmem>>, vector<1x16x128xbf16>
    %6 = vector.shape_cast %5 : vector<1x16x128xbf16> to vector<16x128xbf16>
    %cst = arith.constant dense<0.000000e+00> : vector<256x128xf32>
    %7 = tpu.matmul %4, %6, %cst {dimension_numbers = #tpu.dot_dimension_numbers<[1], [0], [0], [1], [0, 0, 1, 1], [], []>} : vector<256x16xbf16>, vector<16x128xbf16>, vector<256x128xf32> -> vector<256x128xf32>
    %c16_i32 = arith.constant 16 : i32
    %8 = arith.addi %1, %c16_i32 : i32
    %c0_4 = arith.constant 0 : index
    %9 = arith.index_cast %8 : i32 to index
    %c0_5 = arith.constant 0 : index
    %10 = vector.load %arg3[%c0_4, %9, %c0_5] : memref<1x288x16xbf16, #tpu.memory_space<vmem>>, vector<1x256x16xbf16>
    %11 = vector.shape_cast %10 : vector<1x256x16xbf16> to vector<256x16xbf16>
    %c1 = arith.constant 1 : index
    %c0_6 = arith.constant 0 : index
    %c0_7 = arith.constant 0 : index
    %12 = vector.load %arg4[%c1, %c0_6, %c0_7] : memref<3x16x128xbf16, #tpu.memory_space<vmem>>, vector<1x16x128xbf16>
    %13 = vector.shape_cast %12 : vector<1x16x128xbf16> to vector<16x128xbf16>
    %cst_8 = arith.constant dense<0.000000e+00> : vector<256x128xf32>
    %14 = tpu.matmul %11, %13, %cst_8 {dimension_numbers = #tpu.dot_dimension_numbers<[1], [0], [0], [1], [0, 0, 1, 1], [], []>} : vector<256x16xbf16>, vector<16x128xbf16>, vector<256x128xf32> -> vector<256x128xf32>
    %15 = arith.addf %7, %14 : vector<256x128xf32>
    %c32_i32 = arith.constant 32 : i32
    %16 = arith.addi %1, %c32_i32 : i32
    %c0_9 = arith.constant 0 : index
    %17 = arith.index_cast %16 : i32 to index
    %c0_10 = arith.constant 0 : index
    %18 = vector.load %arg3[%c0_9, %17, %c0_10] : memref<1x288x16xbf16, #tpu.memory_space<vmem>>, vector<1x256x16xbf16>
    %19 = vector.shape_cast %18 : vector<1x256x16xbf16> to vector<256x16xbf16>
    %c2 = arith.constant 2 : index
    %c0_11 = arith.constant 0 : index
    %c0_12 = arith.constant 0 : index
    %20 = vector.load %arg4[%c2, %c0_11, %c0_12] : memref<3x16x128xbf16, #tpu.memory_space<vmem>>, vector<1x16x128xbf16>
    %21 = vector.shape_cast %20 : vector<1x16x128xbf16> to vector<16x128xbf16>
    %cst_13 = arith.constant dense<0.000000e+00> : vector<256x128xf32>
    %22 = tpu.matmul %19, %21, %cst_13 {dimension_numbers = #tpu.dot_dimension_numbers<[1], [0], [0], [1], [0, 0, 1, 1], [], []>} : vector<256x16xbf16>, vector<16x128xbf16>, vector<256x128xf32> -> vector<256x128xf32>
    %23 = arith.addf %15, %22 : vector<256x128xf32>
    %cst_14 = arith.constant 0.000000e+00 : f32
    %24 = vector.broadcast %cst_14 : f32 to vector<256x128xf32>
    %25 = arith.maximumf %23, %24 : vector<256x128xf32>
    %c0_15 = arith.constant 0 : index
    %c0_16 = arith.constant 0 : index
    %26 = vector.load %arg5[%c0_15, %c0_16] : memref<256x128xf32, #tpu.memory_space<vmem>>, vector<256x128xf32>
    tpu.vector_store %arg5[%c0_15, %c0_16], %25 {strides = array<i32>} : memref<256x128xf32, #tpu.memory_space<vmem>>, vector<256x128xf32>,
    return
  }
  func.func @transform_0(%arg0: i32, %arg1: i32, %arg2: i32) -> (i32, i32, i32) {
    %c0_i32 = arith.constant 0 : i32
    %c0_i32_0 = arith.constant 0 : i32
    %c0_i32_1 = arith.constant 0 : i32
    return %arg0, %c0_i32, %c0_i32_0 : i32, i32, i32
  }
  func.func @transform_1(%arg0: i32, %arg1: i32, %arg2: i32) -> (i32, i32, i32) {
    %c0_i32 = arith.constant 0 : i32
    %c0_i32_0 = arith.constant 0 : i32
    %c0_i32_1 = arith.constant 0 : i32
    return %c0_i32, %c0_i32_0, %arg2 : i32, i32, i32
  }
  func.func @transform_2(%arg0: i32, %arg1: i32, %arg2: i32) -> (i32, i32) {
    %c1_i32 = arith.constant 1 : i32
    %0 = arith.muli %arg0, %c1_i32 : i32
    %1 = arith.addi %0, %arg1 : i32
    %c0_i32 = arith.constant 0 : i32
    return %1, %arg2 : i32, i32
  }
}

</mosaic_0001>

<bundles_post_ra>
// kernel: unet_up.1
= control target key start
LH: loop header
LB: loop body
LE: loop exit
PB: predicated region body
PF: predicated region fallthrough
CT: control target
= control target key end

     0   :  { %s1631_s9 = smov 0   ;;  %s1633_s10 = smov 0   ;;  %s1858_s0 = inlined_call_operand.vmem [shape: bf16[2,288,16], index: 0, kind: input, shape index: {}]   ;;  %s1859_s1 = inlined_call_operand.vmem [shape: bf16[3,16,128], index: 1, kind: input, shape index: {}]   ;;  %s1860_s2 = inlined_call_operand.vmem [shape: f32[512,128], index: 2, kind: output, shape index: {}]  }
   0x1   :  { %s1635_s11 = smov 0  }
   0x2 LB: > { %s31_s12 = sadd.s32 1, %s1610_s10  ;;  %p1187_p0 = scmp.ge.s32.totalorder %s1614_s11, 1  ;;  %s1614_s11 = sphi %s1635_s11, %s12_s11   ;;  %s1610_s10 = sphi %s1633_s10, %s1862_s10   ;;  %s1606_s9 = sphi %s1631_s9, %s1861_s9  }
   0x3   : > { %p33_p1 = scmp.ge.s32.totalorder %s31_s12, 2  ;;  %p144_p2 = scmp.lt.s32.totalorder %s1614_s11, 3 }
   0x5   : > { %s1864_s12 = smov (%p33_p1, %s31_s12), 0  ;;  %p145_p3 = pnand %p1187_p0, %p144_p2 }
   0x6   : > { %p174_p4 = scmp.lt.s32.totalorder (!%p145_p3), %s1606_s9, 1  ;;  %s1189_s24 = sshll.u32 (!%p145_p3), %s1606_s9, 5 }
   0x7   : > { %148 = sbr.rel (%p145_p3) target bundleno = 341 (0x155), region = 28  ;;  %p185_p5 = scmp.lt.s32.totalorder (!%p145_p3), %s1189_s24, 63 }
   0xc   : > { %v1546_v0 = vld [vmem:[%s1859_s1 + $0x8] sm:$0xff]  ;;  %v1529_v1 = vld [vmem:[%s1859_s1] sm:$0xff]  ;;  %v1563_v2 = vld [vmem:[%s1859_s1 + $0x10] sm:$0xff]  ;;  %s175_s19 = scalar_select %p174_p4, %s1606_s9, 1  ;;  %vm360_vm0 = vcmask 130048  }
   0xd   : > { %416 = vmatpush.bf16.msra.mxu0 %v1546_v0  ;;  %1564 = vmatpush.bf16.msra.mxu3 %v1546_v0  ;;  %s1866_s24 = smov (!%p185_p5, %s1189_s24), 63 }
   0xe   : > { %639 = vmatpush.bf16.msra.mxu1 %v1529_v1  ;;  %902 = vmatpush.bf16.msra.mxu2 %v1563_v2  ;;  %s1567_s20 = smul.u32 144, %s175_s19  ;;  %s1190_s25 = sshll.u32 %s1866_s24, 3 }
   0xf   : > { %s1745_s28 = scalar_lea.vmem %s1860_s2, %s1190_s25 }
  0x10   : > { %s1665_s23 = scalar_lea.vmem %s1858_s0, %s1567_s20 }
  0x11   : > { %1565 = vmatpush.bf16.msrb.mxu3 %v1529_v1  ;;  %v1530_v3 = vld [vmem:[%s1665_s23 + $0x8] sm:$0xff]  ;;  %v1513_v5 = vld [vmem:[%s1665_s23] sm:$0xff]  ;;  %v1547_v6 = vld [vmem:[%s1665_s23 + $0x10] sm:$0xff] }
  0x12   : > { %v1542_v4 = vld [vmem:[%s1665_s23 + $0x68] sm:$0xff]  ;;  %1293 = vmatmul.msk.bf16.vlgmr.msra.gmra.mxu0 %vm360_vm0, %v1530_v3  ;;  %1377 = vmatmul.msk.bf16.vlgmr.msra.gmra.mxu1 %vm360_vm0, %v1513_v5  ;;  %v1531_v7 = vld [vmem:[%s1665_s23 + $0x10] sm:$0xff]  ;;  %v1548_v10 = vld [vmem:[%s1665_s23 + $0x18] sm:$0xff] }
  0x13   : > { %1305 = vmatmul.msk.bf16.vlgmr.msra.gmra.mxu3 %vm360_vm0, %v1542_v4  ;;  %1495 = vmatmul.msk.bf16.vlgmr.msra.gmra.mxu2 %vm360_vm0, %v1547_v6  ;;  %v1543_v8 = vld [vmem:[%s1665_s23 + $0x70] sm:$0xff]  ;;  %v1514_v9 = vld [vmem:[%s1665_s23 + $0x8] sm:$0xff]  ;;  %v1532_v11 = vld [vmem:[%s1665_s23 + $0x18] sm:$0xff] }
  0x14   : > { %v1544_v12 = vld [vmem:[%s1665_s23 + $0x78] sm:$0xff]  ;;  %v1515_v13 = vld [vmem:[%s1665_s23 + $0x10] sm:$0xff]  ;;  %v1549_v14 = vld [vmem:[%s1665_s23 + $0x20] sm:$0xff] }
  0x15   : > { %1566 = vmatpush.bf16.msra.mxu3 %v1563_v2  ;;  %v1533_v15 = vld [vmem:[%s1665_s23 + $0x20] sm:$0xff]  ;;  %v1516_v17 = vld [vmem:[%s1665_s23 + $0x18] sm:$0xff]  ;;  %v1550_v18 = vld [vmem:[%s1665_s23 + $0x28] sm:$0xff] }
  0x16   : > { %v1545_v16 = vld [vmem:[%s1665_s23 + $0x80] sm:$0xff]  ;;  %v1534_v19 = vld [vmem:[%s1665_s23 + $0x28] sm:$0xff]  ;;  %v1551_v22 = vld [vmem:[%s1665_s23 + $0x30] sm:$0xff] }
  0x17   : > { %v1525_v20 = vld [vmem:[%s1665_s23 + $0x60] sm:$0xff]  ;;  %v1535_v23 = vld [vmem:[%s1665_s23 + $0x30] sm:$0xff]  ;;  %v1526_v24 = vld [vmem:[%s1665_s23 + $0x68] sm:$0xff] }
  0x18   : > { %v1517_v21 = vld [vmem:[%s1665_s23 + $0x20] sm:$0xff]  ;;  %v1518_v25 = vld [vmem:[%s1665_s23 + $0x28] sm:$0xff]  ;;  %v1552_v26 = vld [vmem:[%s1665_s23 + $0x38] sm:$0xff] }
  0x19   : > { %v1536_v27 = vld [vmem:[%s1665_s23 + $0x38] sm:$0xff]  ;;  %v1527_v28 = vld [vmem:[%s1665_s23 + $0x70] sm:$0xff]  ;;  %v1553_v30 = vld [vmem:[%s1665_s23 + $0x40] sm:$0xff] }
  0x1a   : > { %v1519_v29 = vld [vmem:[%s1665_s23 + $0x30] sm:$0xff]  ;;  %v1537_v31 = vld [vmem:[%s1665_s23 + $0x40] sm:$0xff]  ;;  %v1528_v32 = vld [vmem:[%s1665_s23 + $0x78] sm:$0xff] }
  0x1b   : > { %v1520_v33 = vld [vmem:[%s1665_s23 + $0x38] sm:$0xff]  ;;  %v1554_v34 = vld [vmem:[%s1665_s23 + $0x48] sm:$0xff]  ;;  %v1559_v36 = vld [vmem:[%s1665_s23 + $0x70] sm:$0xff] }
  0x1c   : > { %v1538_v35 = vld [vmem:[%s1665_s23 + $0x48] sm:$0xff]  ;;  %v1521_v38 = vld [vmem:[%s1665_s23 + $0x40] sm:$0xff]  ;;  %v1555_v39 = vld [vmem:[%s1665_s23 + $0x50] sm:$0xff] }
  0x1d   : > { %v1539_v51 = vld [vmem:[%s1665_s23 + $0x50] sm:$0xff]  ;;  %v1560_v52 = vld [vmem:[%s1665_s23 + $0x78] sm:$0xff]  ;;  %v1522_v55 = vld [vmem:[%s1665_s23 + $0x48] sm:$0xff] }
  0x1e   : > { %v1556_v56 = vld [vmem:[%s1665_s23 + $0x58] sm:$0xff]  ;;  %v1561_v6 = vld [vmem:[%s1665_s23 + $0x80] sm:$0xff] }
  0x1f   : > { %v1540_v5 = vld [vmem:[%s1665_s23 + $0x58] sm:$0xff] }
  0x22   : > { %1294 = vmatmul.msk.bf16.gmra.mxu0 %vm360_vm0, %v1531_v7  ;;  %1378 = vmatmul.msk.bf16.gmra.mxu1 %vm360_vm0, %v1514_v9  ;;  %v1523_v9 = vld [vmem:[%s1665_s23 + $0x50] sm:$0xff] }
  0x23   : > { %1306 = vmatmul.msk.bf16.gmra.mxu3 %vm360_vm0, %v1543_v8  ;;  %1496 = vmatmul.msk.bf16.gmra.mxu2 %vm360_vm0, %v1548_v10  ;;  %v1557_v10 = vld [vmem:[%s1665_s23 + $0x60] sm:$0xff] }
  0x32   : > { %1295 = vmatmul.msk.bf16.gmra.mxu0 %vm360_vm0, %v1532_v11  ;;  %1379 = vmatmul.msk.bf16.gmra.mxu1 %vm360_vm0, %v1515_v13 }
  0x33   : > { %1307 = vmatmul.msk.bf16.gmra.mxu3 %vm360_vm0, %v1544_v12  ;;  %1497 = vmatmul.msk.bf16.gmra.mxu2 %vm360_vm0, %v1549_v14 }
  0x42   : > { %1296 = vmatmul.msk.bf16.gmra.mxu0 %vm360_vm0, %v1533_v15  ;;  %1380 = vmatmul.msk.bf16.gmra.mxu1 %vm360_vm0, %v1516_v17 }
  0x43   : > { %1308 = vmatmul.msk.bf16.gmra.mxu3 %vm360_vm0, %v1545_v16  ;;  %1498 = vmatmul.msk.bf16.gmra.mxu2 %vm360_vm0, %v1550_v18 }
  0x52   : > { %1297 = vmatmul.msk.bf16.gmra.mxu0 %vm360_vm0, %v1534_v19  ;;  %1381 = vmatmul.msk.bf16.gmra.mxu1 %vm360_vm0, %v1517_v21 }
  0x53   : > { %1389 = vmatmul.msk.bf16.vlgmr.msrb.gmra.mxu3 %vm360_vm0, %v1525_v20  ;;  %1499 = vmatmul.msk.bf16.gmra.mxu2 %vm360_vm0, %v1551_v22 }
  0x62   : > { %1298 = vmatmul.msk.bf16.gmra.mxu0 %vm360_vm0, %v1535_v23  ;;  %1382 = vmatmul.msk.bf16.gmra.mxu1 %vm360_vm0, %v1518_v25  ;;  %v1541_v23 = vld [vmem:[%s1665_s23 + $0x60] sm:$0xff] }
  0x63   : > { %1390 = vmatmul.msk.bf16.gmra.mxu3 %vm360_vm0, %v1526_v24  ;;  %1500 = vmatmul.msk.bf16.gmra.mxu2 %vm360_vm0, %v1552_v26  ;;  %v1562_v24 = vld [vmem:[%s1665_s23 + $0x88] sm:$0xff] }
  0x72   : > { %1299 = vmatmul.msk.bf16.gmra.mxu0 %vm360_vm0, %v1536_v27  ;;  %1383 = vmatmul.msk.bf16.gmra.mxu1 %vm360_vm0, %v1519_v29  ;;  %v1524_v27 = vld [vmem:[%s1665_s23 + $0x58] sm:$0xff] }
  0x73   : > { %1391 = vmatmul.msk.bf16.gmra.mxu3 %vm360_vm0, %v1527_v28  ;;  %1501 = vmatmul.msk.bf16.gmra.mxu2 %vm360_vm0, %v1553_v30  ;;  %v1558_v28 = vld [vmem:[%s1665_s23 + $0x68] sm:$0xff] }
  0x82   : > { %1300 = vmatmul.msk.bf16.gmra.mxu0 %vm360_vm0, %v1537_v31  ;;  %1384 = vmatmul.msk.bf16.gmra.mxu1 %vm360_vm0, %v1520_v33 }
  0x83   : > { %1392 = vmatmul.msk.bf16.gmra.mxu3 %vm360_vm0, %v1528_v32  ;;  %1502 = vmatmul.msk.bf16.gmra.mxu2 %vm360_vm0, %v1554_v34 }
  0x8f   : > { %v418_v37 = vpop.f32.mrf.mxu0  ;;  %v641_v40 = vpop.f32.mrf.mxu1 }
  0x90   : > { %v642_v41 = vadd.f32 %v641_v40, %v418_v37 }
  0x92   : > { %1301 = vmatmul.msk.bf16.gmra.mxu0 %vm360_vm0, %v1538_v35  ;;  %1385 = vmatmul.msk.bf16.gmra.mxu1 %vm360_vm0, %v1521_v38 }
  0x93   : > { %1507 = vmatmul.msk.bf16.vlgmr.msra.gmra.mxu3 %vm360_vm0, %v1559_v36  ;;  %1503 = vmatmul.msk.bf16.gmra.mxu2 %vm360_vm0, %v1555_v39 }
  0x96   : > { %v1740_v42 = vpop.f32.mrf.mxu3  ;;  %v904_v43 = vpop.f32.mrf.mxu2 }
  0x97   : > { %v984_v44 = vadd.f32 %v904_v43, %v642_v41  ;;  %v420_v45 = vpop.f32.mrf.mxu0  ;;  %v643_v46 = vpop.f32.mrf.mxu1 }
  0x98   : > { %v644_v48 = vadd.f32 %v643_v46, %v420_v45 }
  0x99   : > { %v1016_v47 = vmax.f32 %v984_v44, 0.0 }
  0x9b   : > { %1048 = vst [vmem:[%s1745_s28] sm:$0xff] %v1016_v47 }
  0x9e   : > { %v1748_v49 = vpop.f32.mrf.mxu3  ;;  %v906_v50 = vpop.f32.mrf.mxu2 }
  0x9f   : > { %v985_v53 = vadd.f32 %v906_v50, %v644_v48  ;;  %v423_v54 = vpop.f32.mrf.mxu0  ;;  %v646_v57 = vpop.f32.mrf.mxu1 }
  0xa0   : > { %v647_v59 = vadd.f32 %v646_v57, %v423_v54 }
  0xa1   : > { %v1017_v58 = vmax.f32 %v985_v53, 0.0 }
  0xa2   : > { %1302 = vmatmul.msk.bf16.gmra.mxu0 %vm360_vm0, %v1539_v51  ;;  %1386 = vmatmul.msk.bf16.gmra.mxu1 %vm360_vm0, %v1522_v55 }
  0xa3   : > { %1508 = vmatmul.msk.bf16.gmra.mxu3 %vm360_vm0, %v1560_v52  ;;  %1049 = vst [vmem:[%s1745_s28 + $0x8] sm:$0xff] %v1017_v58  ;;  %1504 = vmatmul.msk.bf16.gmra.mxu2 %vm360_vm0, %v1556_v56 }
  0xa6   : > { %v1759_v60 = vpop.f32.mrf.mxu3  ;;  %v909_v61 = vpop.f32.mrf.mxu2 }
  0xa7   : > { %v986_v62 = vadd.f32 %v909_v61, %v647_v59  ;;  %v425_v63 = vpop.f32.mrf.mxu0  ;;  %v648_v0 = vpop.f32.mrf.mxu1 }
  0xa8   : > { %v649_v2 = vadd.f32 %v648_v0, %v425_v63 }
  0xa9   : > { %v1018_v1 = vmax.f32 %v986_v62, 0.0 }
  0xab   : > { %1050 = vst [vmem:[%s1745_s28 + $0x10] sm:$0xff] %v1018_v1 }
  0xae   : > { %v1762_v3 = vpop.f32.mrf.mxu3  ;;  %v911_v4 = vpop.f32.mrf.mxu2 }
  0xaf   : > { %v987_v7 = vadd.f32 %v911_v4, %v649_v2  ;;  %v428_v8 = vpop.f32.mrf.mxu0  ;;  %v651_v11 = vpop.f32.mrf.mxu1 }
  0xb0   : > { %v652_v13 = vadd.f32 %v651_v11, %v428_v8 }
  0xb1   : > { %v1019_v12 = vmax.f32 %v987_v7, 0.0 }
  0xb2   : > { %1303 = vmatmul.msk.bf16.gmra.mxu0 %vm360_vm0, %v1540_v5  ;;  %1387 = vmatmul.msk.bf16.gmra.mxu1 %vm360_vm0, %v1523_v9 }
  0xb3   : > { %1509 = vmatmul.msk.bf16.gmra.mxu3 %vm360_vm0, %v1561_v6  ;;  %1051 = vst [vmem:[%s1745_s28 + $0x18] sm:$0xff] %v1019_v12  ;;  %1505 = vmatmul.msk.bf16.gmra.mxu2 %vm360_vm0, %v1557_v10 }
  0xb6   : > { %v1773_v14 = vpop.f32.mrf.mxu3  ;;  %v914_v15 = vpop.f32.mrf.mxu2 }
  0xb7   : > { %v988_v16 = vadd.f32 %v914_v15, %v652_v13  ;;  %v430_v17 = vpop.f32.mrf.mxu0  ;;  %v653_v18 = vpop.f32.mrf.mxu1 }
  0xb8   : > { %v654_v20 = vadd.f32 %v653_v18, %v430_v17 }
  0xb9   : > { %v1020_v19 = vmax.f32 %v988_v16, 0.0 }
  0xbb   : > { %1052 = vst [vmem:[%s1745_s28 + $0x20] sm:$0xff] %v1020_v19 }
  0xbe   : > { %v1776_v21 = vpop.f32.mrf.mxu3  ;;  %v916_v22 = vpop.f32.mrf.mxu2 }
  0xbf   : > { %v989_v25 = vadd.f32 %v916_v22, %v654_v20  ;;  %v433_v26 = vpop.f32.mrf.mxu0  ;;  %v656_v29 = vpop.f32.mrf.mxu1 }
  0xc0   : > { %v657_v31 = vadd.f32 %v656_v29, %v433_v26 }
  0xc1   : > { %v1021_v30 = vmax.f32 %v989_v25, 0.0 }
  0xc2   : > { %1304 = vmatmul.msk.bf16.gmra.mxu0 %vm360_vm0, %v1541_v23  ;;  %1388 = vmatmul.msk.bf16.gmra.mxu1 %vm360_vm0, %v1524_v27 }
  0xc3   : > { %1510 = vmatmul.msk.bf16.gmra.mxu3 %vm360_vm0, %v1562_v24  ;;  %1053 = vst [vmem:[%s1745_s28 + $0x28] sm:$0xff] %v1021_v30  ;;  %1506 = vmatmul.msk.bf16.gmra.mxu2 %vm360_vm0, %v1558_v28 }
  0xc6   : > { %v1787_v32 = vpop.f32.mrf.mxu3  ;;  %v919_v33 = vpop.f32.mrf.mxu2 }
  0xc7   : > { %v990_v34 = vadd.f32 %v919_v33, %v657_v31  ;;  %v435_v35 = vpop.f32.mrf.mxu0  ;;  %v658_v36 = vpop.f32.mrf.mxu1 }
  0xc8   : > { %v659_v38 = vadd.f32 %v658_v36, %v435_v35 }
  0xc9   : > { %v1022_v37 = vmax.f32 %v990_v34, 0.0 }
  0xcb   : > { %1054 = vst [vmem:[%s1745_s28 + $0x30] sm:$0xff] %v1022_v37 }
  0xce   : > { %v1790_v39 = vpop.f32.mrf.mxu3  ;;  %v921_v40 = vpop.f32.mrf.mxu2 }
  0xcf   : > { %v991_v41 = vadd.f32 %v921_v40, %v659_v38  ;;  %v438_v43 = vpop.f32.mrf.mxu0  ;;  %v661_v44 = vpop.f32.mrf.mxu1 }
  0xd0   : > { %v662_v46 = vadd.f32 %v661_v44, %v438_v43 }
  0xd1   : > { %v1023_v45 = vmax.f32 %v991_v41, 0.0 }
  0xd3   : > { %1055 = vst [vmem:[%s1745_s28 + $0x38] sm:$0xff] %v1023_v45 }
  0xd6   : > { %v1793_v47 = vpop.f32.mrf.mxu3  ;;  %v924_v48 = vpop.f32.mrf.mxu2 }
  0xd7   : > { %v992_v50 = vadd.f32 %v924_v48, %v662_v46  ;;  %v440_v51 = vpop.f32.mrf.mxu0  ;;  %v663_v52 = vpop.f32.mrf.mxu1  ;;  %v702_v48 = vadd.f32 %v1793_v47, %v1740_v42 }
  0xd8   : > { %v664_v54 = vadd.f32 %v663_v52, %v440_v51 }
  0xd9   : > { %v1024_v53 = vmax.f32 %v992_v50, 0.0 }
  0xdb   : > { %1056 = vst [vmem:[%s1745_s28 + $0x40] sm:$0xff] %v1024_v53 }
  0xde   : > { %v1796_v55 = vpop.f32.mrf.mxu3  ;;  %v926_v56 = vpop.f32.mrf.mxu2 }
  0xdf   : > { %v993_v57 = vadd.f32 %v926_v56, %v664_v54  ;;  %v443_v58 = vpop.f32.mrf.mxu0  ;;  %v666_v59 = vpop.f32.mrf.mxu1 }
  0xe0   : > { %v667_v62 = vadd.f32 %v666_v59, %v443_v58  ;;  %v704_v59 = vadd.f32 %v1796_v55, %v1748_v49 }
  0xe1   : > { %v1025_v61 = vmax.f32 %v993_v57, 0.0 }
  0xe3   : > { %1057 = vst [vmem:[%s1745_s28 + $0x48] sm:$0xff] %v1025_v61 }
  0xe6   : > { %v1799_v63 = vpop.f32.mrf.mxu3  ;;  %v929_v0 = vpop.f32.mrf.mxu2 }
  0xe7   : > { %v994_v1 = vadd.f32 %v929_v0, %v667_v62  ;;  %v445_v2 = vpop.f32.mrf.mxu0  ;;  %v668_v4 = vpop.f32.mrf.mxu1 }
  0xe8   : > { %v669_v6 = vadd.f32 %v668_v4, %v445_v2 }
  0xe9   : > { %v1026_v5 = vmax.f32 %v994_v1, 0.0 }
  0xeb   : > { %1058 = vst [vmem:[%s1745_s28 + $0x50] sm:$0xff] %v1026_v5 }
  0xee   : > { %v1802_v7 = vpop.f32.mrf.mxu3  ;;  %v931_v8 = vpop.f32.mrf.mxu2 }
  0xef   : > { %v995_v9 = vadd.f32 %v931_v8, %v669_v6  ;;  %v448_v10 = vpop.f32.mrf.mxu0  ;;  %v671_v11 = vpop.f32.mrf.mxu1  ;;  %v707_v8 = vadd.f32 %v1799_v63, %v1759_v60 }
  0xf0   : > { %v672_v13 = vadd.f32 %v671_v11, %v448_v10 }
  0xf1   : > { %v1027_v12 = vmax.f32 %v995_v9, 0.0 }
  0xf3   : > { %1059 = vst [vmem:[%s1745_s28 + $0x58] sm:$0xff] %v1027_v12 }
  0xf6   : > { %v1805_v15 = vpop.f32.mrf.mxu3  ;;  %v934_v16 = vpop.f32.mrf.mxu2 }
  0xf7   : > { %v996_v17 = vadd.f32 %v934_v16, %v672_v13  ;;  %v450_v18 = vpop.f32.mrf.mxu0  ;;  %v673_v19 = vpop.f32.mrf.mxu1 }
  0xf8   : > { %v674_v22 = vadd.f32 %v673_v19, %v450_v18 }
  0xf9   : > { %v1028_v20 = vmax.f32 %v996_v17, 0.0  ;;  %v709_v17 = vadd.f32 %v1802_v7, %v1762_v3 }
  0xfb   : > { %1060 = vst [vmem:[%s1745_s28 + $0x60] sm:$0xff] %v1028_v20 }
  0xfe   : > { %v1808_v23 = vpop.f32.mrf.mxu3  ;;  %v936_v24 = vpop.f32.mrf.mxu2 }
  0xff   : > { %v997_v25 = vadd.f32 %v936_v24, %v674_v22  ;;  %v453_v26 = vpop.f32.mrf.mxu0  ;;  %v676_v27 = vpop.f32.mrf.mxu1 }
 0x100   : > { %v677_v29 = vadd.f32 %v676_v27, %v453_v26 }
 0x101   : > { %v1029_v28 = vmax.f32 %v997_v25, 0.0 }
 0x103   : > { %1061 = vst [vmem:[%s1745_s28 + $0x68] sm:$0xff] %v1029_v28  ;;  %v712_v28 = vadd.f32 %v1805_v15, %v1773_v14 }
 0x106   : > { %v1811_v30 = vpop.f32.mrf.mxu3  ;;  %v939_v31 = vpop.f32.mrf.mxu2 }
 0x107   : > { %v998_v33 = vadd.f32 %v939_v31, %v677_v29  ;;  %v455_v34 = vpop.f32.mrf.mxu0  ;;  %v678_v35 = vpop.f32.mrf.mxu1 }
 0x108   : > { %v679_v37 = vadd.f32 %v678_v35, %v455_v34 }
 0x109   : > { %v1030_v36 = vmax.f32 %v998_v33, 0.0 }
 0x10b   : > { %1062 = vst [vmem:[%s1745_s28 + $0x70] sm:$0xff] %v1030_v36 }
 0x10e   : > { %v1814_v38 = vpop.f32.mrf.mxu3  ;;  %v941_v40 = vpop.f32.mrf.mxu2 }
 0x10f   : > { %v999_v41 = vadd.f32 %v941_v40, %v679_v37  ;;  %v458_v43 = vpop.f32.mrf.mxu0  ;;  %v681_v44 = vpop.f32.mrf.mxu1  ;;  %v714_v37 = vadd.f32 %v1808_v23, %v1776_v21 }
 0x110   : > { %v682_v46 = vadd.f32 %v681_v44, %v458_v43 }
 0x111   : > { %v1031_v45 = vmax.f32 %v999_v41, 0.0 }
 0x113   : > { %1063 = vst [vmem:[%s1745_s28 + $0x78] sm:$0xff] %v1031_v45 }
 0x116   : > { %v964_v50 = vpop.f32.mrf.mxu3  ;;  %v944_v51 = vpop.f32.mrf.mxu2 }
 0x117   : > { %v1008_v52 = vadd.f32 %v964_v50, %v702_v48  ;;  %v1000_v53 = vadd.f32 %v944_v51, %v682_v46  ;;  %v460_v54 = vpop.f32.mrf.mxu0  ;;  %v683_v57 = vpop.f32.mrf.mxu1  ;;  %v717_v51 = vadd.f32 %v1811_v30, %v1787_v32 }
 0x118   : > { %v684_v61 = vadd.f32 %v683_v57, %v460_v54 }
 0x119   : > { %v1040_v56 = vmax.f32 %v1008_v52, 0.0  ;;  %v1032_v58 = vmax.f32 %v1000_v53, 0.0 }
 0x11b   : > { %1072 = vst [vmem:[%s1745_s28 + $0xc0] sm:$0xff] %v1040_v56 }
 0x11c   : > { %1064 = vst [vmem:[%s1745_s28 + $0x80] sm:$0xff] %v1032_v58 }
 0x11e   : > { %v966_v62 = vpop.f32.mrf.mxu3  ;;  %v946_v0 = vpop.f32.mrf.mxu2 }
 0x11f   : > { %v1009_v1 = vadd.f32 %v966_v62, %v704_v59  ;;  %v1001_v42 = vadd.f32 %v946_v0, %v684_v61  ;;  %v463_v47 = vpop.f32.mrf.mxu0  ;;  %v686_v4 = vpop.f32.mrf.mxu1  ;;  %v719_v59 = vadd.f32 %v1814_v38, %v1790_v39 }
 0x120   : > { %v687_v6 = vadd.f32 %v686_v4, %v463_v47 }
 0x121   : > { %v1041_v2 = vmax.f32 %v1009_v1, 0.0  ;;  %v1033_v5 = vmax.f32 %v1001_v42, 0.0 }
 0x123   : > { %1073 = vst [vmem:[%s1745_s28 + $0xc8] sm:$0xff] %v1041_v2 }
 0x124   : > { %1065 = vst [vmem:[%s1745_s28 + $0x88] sm:$0xff] %v1033_v5 }
 0x126   : > { %v969_v9 = vpop.f32.mrf.mxu3  ;;  %v949_v10 = vpop.f32.mrf.mxu2 }
 0x127   : > { %v1010_v49 = vadd.f32 %v969_v9, %v707_v8  ;;  %v1002_v55 = vadd.f32 %v949_v10, %v687_v6  ;;  %v465_v11 = vpop.f32.mrf.mxu0  ;;  %v688_v13 = vpop.f32.mrf.mxu1 }
 0x128   : > { %v689_v18 = vadd.f32 %v688_v13, %v465_v11 }
 0x129   : > { %v1042_v12 = vmax.f32 %v1010_v49, 0.0  ;;  %v1034_v16 = vmax.f32 %v1002_v55, 0.0 }
 0x12b   : > { %1074 = vst [vmem:[%s1745_s28 + $0xd0] sm:$0xff] %v1042_v12 }
 0x12c   : > { %1066 = vst [vmem:[%s1745_s28 + $0x90] sm:$0xff] %v1034_v16 }
 0x12e   : > { %v971_v19 = vpop.f32.mrf.mxu3  ;;  %v951_v20 = vpop.f32.mrf.mxu2 }
 0x12f   : > { %v1011_v22 = vadd.f32 %v971_v19, %v709_v17  ;;  %v1003_v60 = vadd.f32 %v951_v20, %v689_v18  ;;  %v468_v63 = vpop.f32.mrf.mxu0  ;;  %v691_v25 = vpop.f32.mrf.mxu1 }
 0x130   : > { %v692_v27 = vadd.f32 %v691_v25, %v468_v63 }
 0x131   : > { %v1043_v24 = vmax.f32 %v1011_v22, 0.0  ;;  %v1035_v26 = vmax.f32 %v1003_v60, 0.0 }
 0x133   : > { %1075 = vst [vmem:[%s1745_s28 + $0xd8] sm:$0xff] %v1043_v24 }
 0x134   : > { %1067 = vst [vmem:[%s1745_s28 + $0x98] sm:$0xff] %v1035_v26 }
 0x136   : > { %v974_v29 = vpop.f32.mrf.mxu3  ;;  %v954_v31 = vpop.f32.mrf.mxu2 }
 0x137   : > { %v1012_v3 = vadd.f32 %v974_v29, %v712_v28  ;;  %v1004_v7 = vadd.f32 %v954_v31, %v692_v27  ;;  %v470_v33 = vpop.f32.mrf.mxu0  ;;  %v693_v35 = vpop.f32.mrf.mxu1 }
 0x138   : > { %v694_v40 = vadd.f32 %v693_v35, %v470_v33 }
 0x139   : > { %v1044_v34 = vmax.f32 %v1012_v3, 0.0  ;;  %v1036_v36 = vmax.f32 %v1004_v7, 0.0 }
 0x13b   : > { %1076 = vst [vmem:[%s1745_s28 + $0xe0] sm:$0xff] %v1044_v34 }
 0x13c   : > { %1068 = vst [vmem:[%s1745_s28 + $0xa0] sm:$0xff] %v1036_v36 }
 0x13e   : > { %v976_v41 = vpop.f32.mrf.mxu3  ;;  %v956_v43 = vpop.f32.mrf.mxu2 }
 0x13f   : > { %v1013_v44 = vadd.f32 %v976_v41, %v714_v37  ;;  %v1005_v14 = vadd.f32 %v956_v43, %v694_v40  ;;  %v473_v45 = vpop.f32.mrf.mxu0  ;;  %v696_v46 = vpop.f32.mrf.mxu1 }
 0x140   : > { %v697_v50 = vadd.f32 %v696_v46, %v473_v45 }
 0x141   : > { %v1045_v15 = vmax.f32 %v1013_v44, 0.0  ;;  %v1037_v48 = vmax.f32 %v1005_v14, 0.0 }
 0x143   : > { %1077 = vst [vmem:[%s1745_s28 + $0xe8] sm:$0xff] %v1045_v15 }
 0x144   : > { %1069 = vst [vmem:[%s1745_s28 + $0xa8] sm:$0xff] %v1037_v48 }
 0x146   : > { %v979_v52 = vpop.f32.mrf.mxu3  ;;  %v959_v53 = vpop.f32.mrf.mxu2 }
 0x147   : > { %v1014_v21 = vadd.f32 %v979_v52, %v717_v51  ;;  %v1006_v23 = vadd.f32 %v959_v53, %v697_v50  ;;  %v475_v57 = vpop.f32.mrf.mxu0  ;;  %v698_v58 = vpop.f32.mrf.mxu1 }
 0x148   : > { %v699_v61 = vadd.f32 %v698_v58, %v475_v57 }
 0x149   : > { %v1046_v54 = vmax.f32 %v1014_v21, 0.0  ;;  %v1038_v56 = vmax.f32 %v1006_v23, 0.0 }
 0x14b   : > { %1078 = vst [vmem:[%s1745_s28 + $0xf0] sm:$0xff] %v1046_v54 }
 0x14c   : > { %1070 = vst [vmem:[%s1745_s28 + $0xb0] sm:$0xff] %v1038_v56 }
 0x14e   : > { %v981_v62 = vpop.f32.mrf.mxu3  ;;  %v961_v0 = vpop.f32.mrf.mxu2 }
 0x14f   : > { %v1015_v1 = vadd.f32 %v981_v62, %v719_v59  ;;  %v1007_v32 = vadd.f32 %v961_v0, %v699_v61 }
 0x151   : > { %v1047_v30 = vmax.f32 %v1015_v1, 0.0  ;;  %v1039_v42 = vmax.f32 %v1007_v32, 0.0 }
 0x153   : > { %1079 = vst [vmem:[%s1745_s28 + $0xf8] sm:$0xff] %v1047_v30 }
 0x154   : > { %1071 = vst [vmem:[%s1745_s28 + $0xb8] sm:$0xff] %v1039_v42 }
 0x155 PF: > { %s12_s11 = sadd.s32 1, %s1614_s11   ;;  %s1861_s9 = smov %s1610_s10 }
 0x156   : > { %p9_p6 = scmp.ge.s32.totalorder %s12_s11, 4   ;;  %s1862_s10 = smov %s1864_s12 }
 0x158   :  { %11 = sbr.rel (!%p9_p6) target bundleno = 2 (0x2), region = 66 }

</bundles_post_ra>
